<compile_context>
chip_gen: v6e
topology: v6e:2x2x1
jax: 0.10.0
libtpu: 0.0.40
codegen_flags: <defaults>
</compile_context>

<pallas_src>
import functools

import jax
import jax.numpy as jnp
from jax import lax
from jax.experimental import pallas as pl
from jax.experimental.pallas import tpu as pltpu


def _linear_kernel(x_ref, w_ref, b_ref, o_ref, acc_ref, *, k_total, tk,
                   ragged_k, compute_dtype):
    # x_ref  : (tm, tk)  input tile
    # w_ref  : (tn, tk)  weight tile in native PyTorch (N, K) layout
    # b_ref  : (1,  tn)  bias tile
    # o_ref  : (tm, tn)  output tile (revisited across the K axis)
    # acc_ref: (tm, tn)  f32 accumulator scratch (persists across K steps)
    k = pl.program_id(2)

    @pl.when(k == 0)
    def _():
        acc_ref[...] = jnp.zeros_like(acc_ref)

    x_t = x_ref[...]
    w_t = w_ref[...]

    if ragged_k:
        # Only the final K step has out-of-range (undefined) columns; zeroing
        # both operand tiles keeps the reduction exact without any per-call
        # HBM padding of x / weight.
        lim = k_total - k * tk
        x_t = jnp.where(lax.broadcasted_iota(jnp.int32, x_t.shape, 1) < lim, x_t, 0)
        w_t = jnp.where(lax.broadcasted_iota(jnp.int32, w_t.shape, 1) < lim, w_t, 0)

    if compute_dtype is not None:
        x_t = x_t.astype(compute_dtype)
        w_t = w_t.astype(compute_dtype)

    # x @ w.T: contract dim 1 (K) of both operands. Weight stays in its
    # native (N, K) layout; the RHS is latched transposed into the MXU, so
    # there is no HBM transpose and no per-step XLU transpose.
    acc_ref[...] += lax.dot_general(
        x_t,
        w_t,
        dimension_numbers=(((1,), (1,)), ((), ())),
        preferred_element_type=jnp.float32,
    )

    @pl.when(k == pl.num_programs(2) - 1)
    def _():
        # Epilogue: bias add in f32, single downcast, single store.
        o_ref[...] = (acc_ref[...] + b_ref[...].astype(jnp.float32)).astype(o_ref.dtype)


@functools.partial(jax.jit, static_argnames=("tm", "tn", "tk", "compute_in_bf16"))
def linear_pallas(x, weight, bias=None, *, tm=512, tn=512, tk=2048,
                  compute_in_bf16=False):
    """y = x @ weight.T + bias, computed with a K-tiled Pallas TPU GEMM."""
    M, K = x.shape
    N, K2 = weight.shape
    assert K == K2, "in_features mismatch"
    out_dtype = x.dtype

    if bias is None:
        bias = jnp.zeros((N,), dtype=x.dtype)

    # Keep the output lane-dense: a last dim < 128 lowers to masked partial
    # stores, which dominate small-kernel wall clock. Padding is tiny here.
    n_orig = N
    if N < 128:
        weight = jnp.pad(weight, ((0, 128 - N), (0, 0)))
        bias = jnp.pad(bias, (0, 128 - N))
        N = 128

    # ---- tile selection -------------------------------------------------
    tm = min(tm, M)
    tn = min(tn, N)
    tk = min(tk, K)

    # v7x has 2 TensorCores: if the M axis collapses to a single block, split
    # N so the 'parallel' j axis still has >= 2 blocks to shard across cores.
    if pl.cdiv(M, tm) == 1 and pl.cdiv(N, tn) == 1 and N >= 256:
        half = (N + 1) // 2
        tn = ((half + 127) // 128) * 128

    # Fit the double-buffered working set under ~40 MiB so it leaves headroom
    # even on v7x's 64 MiB VMEM (v5e/v6e have 128 MiB).
    itemsize = jnp.dtype(x.dtype).itemsize

    def _footprint(tm_, tn_, tk_):
        return (2 * (tm_ * tk_ + tn_ * tk_ + tm_ * tn_) * itemsize  # dbl-buffered I/O
                + 2 * tn_ * itemsize                                # bias
                + tm_ * tn_ * 4)                                    # f32 accumulator

    budget = 40 << 20
    while _footprint(tm, tn, tk) > budget and tk > 512 and (tk // 2) % 128 == 0:
        tk //= 2
    while _footprint(tm, tn, tk) > budget and tm > 128 and (tm // 2) % 8 == 0:
        tm //= 2

    grid = (pl.cdiv(M, tm), pl.cdiv(N, tn), pl.cdiv(K, tk))
    ragged_k = (K % tk) != 0
    b2 = bias.reshape(1, N)

    compute_dtype = (jnp.bfloat16
                     if (compute_in_bf16 and x.dtype == jnp.float32) else None)

    kernel = functools.partial(
        _linear_kernel, k_total=K, tk=tk, ragged_k=ragged_k,
        compute_dtype=compute_dtype)

    # Re-streaming-aware cost estimate: x is re-read once per N block-column,
    # weight once per M block-row.
    cost = pl.CostEstimate(
        flops=2 * M * N * K,
        bytes_accessed=(grid[1] * M * K + grid[0] * N * K + M * N + N) * itemsize,
        transcendentals=0,
    )

    vmem_limit = int(min(max(_footprint(tm, tn, tk) * 5 // 4, 16 << 20), 56 << 20))

    out = pl.pallas_call(
        kernel,
        out_shape=jax.ShapeDtypeStruct((M, N), out_dtype),
        grid_spec=pltpu.PrefetchScalarGridSpec(
            num_scalar_prefetch=0,
            grid=grid,
            in_specs=[
                pl.BlockSpec((tm, tk), lambda i, j, k: (i, k)),   # x rows / K slab
                pl.BlockSpec((tn, tk), lambda i, j, k: (j, k)),   # weight (N,K) native
                pl.BlockSpec((1, tn), lambda i, j, k: (0, j)),    # bias slice
            ],
            out_specs=pl.BlockSpec((tm, tn), lambda i, j, k: (i, j)),
            scratch_shapes=[pltpu.VMEM((tm, tn), jnp.float32)],
        ),
        compiler_params=pltpu.CompilerParams(
            # M and N are independent (megacore-shardable); K revisits the
            # output block so it must be 'arbitrary' and sits last in the grid.
            dimension_semantics=("parallel", "parallel", "arbitrary"),
            vmem_limit_bytes=vmem_limit,
        ),
        cost_estimate=cost,
    )(x, weight, b2)

    if n_orig != N:
        out = out[:, :n_orig]
    return out


if __name__ == "__main__":
    key = jax.random.PRNGKey(0)

    # Case 1: shapes consistent with the module: batch=8, in=32, out=64
    # (exercises the small-N lane-dense padding path).
    kx, kw, kb = jax.random.split(key, 3)
    x = jax.random.normal(kx, (8, 32), dtype=jnp.float32)
    weight = jax.random.normal(kw, (64, 32), dtype=jnp.float32) * 0.1
    bias = jax.random.normal(kb, (64,), dtype=jnp.float32) * 0.1

    y = jax.block_until_ready(linear_pallas(x, weight, bias))
    y_ref = jnp.dot(x, weight.T, precision=lax.Precision.HIGHEST) + bias
    assert y.shape == (8, 64)
    assert jnp.allclose(y, y_ref, atol=1e-3, rtol=1e-3)

    # Case 2: exercises K tiling + in-kernel ragged-K masking + N block split.
    kx2, kw2, kb2 = jax.random.split(jax.random.PRNGKey(1), 3)
    x2 = jax.random.normal(kx2, (16, 320), dtype=jnp.float32)
    w2 = jax.random.normal(kw2, (256, 320), dtype=jnp.float32) * 0.05
    b2 = jax.random.normal(kb2, (256,), dtype=jnp.float32) * 0.05

    y2 = jax.block_until_ready(linear_pallas(x2, w2, b2, tk=256))
    y2_ref = jnp.dot(x2, w2.T, precision=lax.Precision.HIGHEST) + b2
    assert y2.shape == (16, 256)
    assert jnp.allclose(y2, y2_ref, atol=1e-3, rtol=1e-3)

    print("KERNEL_OK")
</pallas_src>

<mosaic_0001>
module attributes {stable_mosaic.version = 11 : i64} {
  func.func @_linear_kernel(%arg0: i32, %arg1: i32, %arg2: i32, %arg3: memref<8x32xf32, #tpu.memory_space<vmem>>, %arg4: memref<128x32xf32, #tpu.memory_space<vmem>>, %arg5: memref<1x128xf32, #tpu.memory_space<vmem>>, %arg6: memref<8x128xf32, #tpu.memory_space<vmem>>, %arg7: memref<8x128xf32, #tpu.memory_space<vmem>>) attributes {dimension_semantics = [#tpu.dimension_semantics<parallel>, #tpu.dimension_semantics<parallel>, #tpu.dimension_semantics<arbitrary>], iteration_bounds = array<i64: 1, 1, 1>, scalar_prefetch = 0 : i64, scratch_operands = 1 : i64, tpu.core_type = #tpu.core_type<tc>, window_params = [{transform_indices = @transform_0, window_bounds = array<i64: 8, 32>}, {transform_indices = @transform_1, window_bounds = array<i64: 128, 32>}, {transform_indices = @transform_2, window_bounds = array<i64: 1, 128>}, {transform_indices = @transform_3, window_bounds = array<i64: 8, 128>}]} {
    %c0_i32 = arith.constant 0 : i32
    %0 = arith.cmpi eq, %arg2, %c0_i32 : i32
    %1 = arith.extui %0 : i1 to i32
    %c0_i32_0 = arith.constant 0 : i32
    %2 = arith.cmpi ne, %1, %c0_i32_0 : i32
    scf.if %2 {
      %cst_10 = arith.constant 0.000000e+00 : f32
      %12 = vector.broadcast %cst_10 : f32 to vector<8x128xf32>
      %c0_11 = arith.constant 0 : index
      %c0_12 = arith.constant 0 : index
      %13 = vector.load %arg7[%c0_11, %c0_12] : memref<8x128xf32, #tpu.memory_space<vmem>>, vector<8x128xf32>
      tpu.vector_store %arg7[%c0_11, %c0_12], %12 {strides = array<i32>} : memref<8x128xf32, #tpu.memory_space<vmem>>, vector<8x128xf32>,
    } else {
    }
    %c0 = arith.constant 0 : index
    %c0_1 = arith.constant 0 : index
    %3 = vector.load %arg3[%c0, %c0_1] : memref<8x32xf32, #tpu.memory_space<vmem>>, vector<8x32xf32>
    %c0_2 = arith.constant 0 : index
    %c0_3 = arith.constant 0 : index
    %4 = vector.load %arg4[%c0_2, %c0_3] : memref<128x32xf32, #tpu.memory_space<vmem>>, vector<128x32xf32>
    %c0_4 = arith.constant 0 : index
    %c0_5 = arith.constant 0 : index
    %5 = vector.load %arg7[%c0_4, %c0_5] : memref<8x128xf32, #tpu.memory_space<vmem>>, vector<8x128xf32>
    %cst = arith.constant dense<0.000000e+00> : vector<8x128xf32>
    %6 = tpu.matmul %3, %4, %cst {dimension_numbers = #tpu.dot_dimension_numbers<[1], [1], [0], [0], [0, 0, 1, 0], [], []>} : vector<8x32xf32>, vector<128x32xf32>, vector<8x128xf32> -> vector<8x128xf32>
    %7 = arith.addf %5, %6 : vector<8x128xf32>
    %c0_6 = arith.constant 0 : index
    %c0_7 = arith.constant 0 : index
    %8 = vector.load %arg7[%c0_6, %c0_7] : memref<8x128xf32, #tpu.memory_space<vmem>>, vector<8x128xf32>
    tpu.vector_store %arg7[%c0_6, %c0_7], %7 {strides = array<i32>} : memref<8x128xf32, #tpu.memory_space<vmem>>, vector<8x128xf32>,
    %c0_i32_8 = arith.constant 0 : i32
    %9 = arith.cmpi eq, %arg2, %c0_i32_8 : i32
    %10 = arith.extui %9 : i1 to i32
    %c0_i32_9 = arith.constant 0 : i32
    %11 = arith.cmpi ne, %10, %c0_i32_9 : i32
    scf.if %11 {
      %c0_10 = arith.constant 0 : index
      %c0_11 = arith.constant 0 : index
      %12 = vector.load %arg7[%c0_10, %c0_11] : memref<8x128xf32, #tpu.memory_space<vmem>>, vector<8x128xf32>
      %c0_12 = arith.constant 0 : index
      %c0_13 = arith.constant 0 : index
      %13 = vector.load %arg5[%c0_12, %c0_13] : memref<1x128xf32, #tpu.memory_space<vmem>>, vector<1x128xf32>
      %14 = vector.broadcast %13 : vector<1x128xf32> to vector<8x128xf32>
      %15 = arith.addf %12, %14 : vector<8x128xf32>
      %c0_14 = arith.constant 0 : index
      %c0_15 = arith.constant 0 : index
      %16 = vector.load %arg6[%c0_14, %c0_15] : memref<8x128xf32, #tpu.memory_space<vmem>>, vector<8x128xf32>
      tpu.vector_store %arg6[%c0_14, %c0_15], %15 {strides = array<i32>} : memref<8x128xf32, #tpu.memory_space<vmem>>, vector<8x128xf32>,
    } else {
    }
    return
  }
  func.func @transform_0(%arg0: i32, %arg1: i32, %arg2: i32) -> (i32, i32) {
    %c0_i32 = arith.constant 0 : i32
    return %arg0, %arg2 : i32, i32
  }
  func.func @transform_1(%arg0: i32, %arg1: i32, %arg2: i32) -> (i32, i32) {
    %c0_i32 = arith.constant 0 : i32
    return %arg1, %arg2 : i32, i32
  }
  func.func @transform_2(%arg0: i32, %arg1: i32, %arg2: i32) -> (i32, i32) {
    %c0_i32 = arith.constant 0 : i32
    %c0_i32_0 = arith.constant 0 : i32
    return %c0_i32, %arg1 : i32, i32
  }
  func.func @transform_3(%arg0: i32, %arg1: i32, %arg2: i32) -> (i32, i32) {
    %c0_i32 = arith.constant 0 : i32
    return %arg0, %arg1 : i32, i32
  }
}

</mosaic_0001>

<bundles_post_ra>
// kernel: linear_pallas.1
= control target key start
LH: loop header
LB: loop body
LE: loop exit
PB: predicated region body
PF: predicated region fallthrough
CT: control target
= control target key end

     0   :  { %vm38_vm0 = vcmask 261120   ;;  %v284_v1 = vmov 0.0   ;;  %vm285_vm1 = vmmov 0   ;;  %s381_s0 = inlined_call_operand.vmem [shape: f32[8,32], index: 0, kind: input, shape index: {}]   ;;  %s382_s1 = inlined_call_operand.vmem [shape: f32[128,32], index: 1, kind: input, shape index: {}]   ;;  %s383_s2 = inlined_call_operand.vmem [shape: f32[1,128], index: 2, kind: input, shape index: {}]   ;;  %s384_s3 = inlined_call_operand.hbm [shape: f32[8,128], index: 3, kind: output, shape index: {}]  }
   0x1   :  { %v36_v0 = vld [vmem:[%s382_s1 + $0x78] sm:$0xff]  ;;  %224 = vmatprep.subr.mxu0 %v284_v1  ;;  %256 = vmatprep.mubr.msk.f32.mxu0 %vm285_vm1, %v284_v1  ;;  %v35_v2 = vld [vmem:[%s382_s1 + $0x70] sm:$0xff] }
   0x2   :  { %225 = vmatpush3.xpose.msk.msra.mxu0 %vm38_vm0, %v36_v0 }
   0x3   :  { %226 = vmatprep.subr.mxu0 %v284_v1 }
   0x4   :  { %8 = vsyncpa [#allocation4], 0  ;;  %v34_v3 = vld [vmem:[%s382_s1 + $0x68] sm:$0xff]  ;;  %v33_v4 = vld [vmem:[%s382_s1 + $0x60] sm:$0xff]  ;;  %s286_s21 = smov [#allocation3]  }
   0x5   :  { %v32_v5 = vld [vmem:[%s382_s1 + $0x58] sm:$0xff]  ;;  %v31_v6 = vld [vmem:[%s382_s1 + $0x50] sm:$0xff]  ;;  %v30_v7 = vld [vmem:[%s382_s1 + $0x48] sm:$0xff]  ;;  %s181_s22 = sshll.u32 %s286_s21, 4  ;;  %s182_s22 = int_to_ptr.vmem [resolvable:$true] %s181_s22 }
   0x6   :  { %227 = vmatpush3.xpose.msk.msra.mxu0 %vm38_vm0, %v35_v2  ;;  %v29_v8 = vld [vmem:[%s382_s1 + $0x40] sm:$0xff]  ;;  %v28_v9 = vld [vmem:[%s382_s1 + $0x38] sm:$0xff]  ;;  %v27_v10 = vld [vmem:[%s382_s1 + $0x30] sm:$0xff]  ;;  %p267_p1 = scmp.lt.s32.totalorder %s182_s22, %s182_s22 }
   0x7   :  { %228 = vmatprep.subr.mxu0 %v284_v1  ;;  %v26_v11 = vld [vmem:[%s382_s1 + $0x28] sm:$0xff]  ;;  %v25_v12 = vld [vmem:[%s382_s1 + $0x20] sm:$0xff]  ;;  %v24_v13 = vld [vmem:[%s382_s1 + $0x18] sm:$0xff] }
   0x8   :  { %v23_v14 = vld [vmem:[%s382_s1 + $0x10] sm:$0xff]  ;;  %v22_v15 = vld [vmem:[%s382_s1 + $0x8] sm:$0xff]  ;;  %v21_v16 = vld [vmem:[%s382_s1] sm:$0xff]  ;;  %s262_s1 = scalar_lea.vmem %s182_s22, 128 }
   0x9   :  { %v20_v17 = vld [vmem:[%s381_s0] sm:$0xff]  ;;  %p263_p0 = scmp.ne.s32.totalorder %s182_s22, %s262_s1  ;;  %p268_p2 = scmp.lt.s32.totalorder %s262_s1, %s262_s1 }
   0xa   :  { %229 = vmatpush3.xpose.msk.msra.mxu0 %vm38_vm0, %v34_v3  ;;  %v206_v18 = vld [vmem:[%s383_s2] ss:$0 sm:$0xff] }
   0xb   :  { %230 = vmatprep.subr.mxu0 %v284_v1  ;;  %p269_p3 = por %p268_p2, %p267_p1 }
   0xd   :  { %p270_p4 = pnand %p269_p3, %p263_p0 }
   0xe   :  { %231 = vmatpush3.xpose.msk.msra.mxu0 %vm38_vm0, %v33_v4 }
   0xf   :  { %232 = vmatprep.subr.mxu0 %v284_v1 }
  0x12   :  { %233 = vmatpush3.xpose.msk.msra.mxu0 %vm38_vm0, %v32_v5 }
  0x13   :  { %234 = vmatprep.subr.mxu0 %v284_v1 }
  0x16   :  { %235 = vmatpush3.xpose.msk.msra.mxu0 %vm38_vm0, %v31_v6 }
  0x17   :  { %236 = vmatprep.subr.mxu0 %v284_v1 }
  0x1a   :  { %237 = vmatpush3.xpose.msk.msra.mxu0 %vm38_vm0, %v30_v7 }
  0x1b   :  { %238 = vmatprep.subr.mxu0 %v284_v1 }
  0x1e   :  { %239 = vmatpush3.xpose.msk.msra.mxu0 %vm38_vm0, %v29_v8 }
  0x1f   :  { %240 = vmatprep.subr.mxu0 %v284_v1 }
  0x22   :  { %241 = vmatpush3.xpose.msk.msra.mxu0 %vm38_vm0, %v28_v9 }
  0x23   :  { %242 = vmatprep.subr.mxu0 %v284_v1 }
  0x26   :  { %243 = vmatpush3.xpose.msk.msra.mxu0 %vm38_vm0, %v27_v10 }
  0x27   :  { %244 = vmatprep.subr.mxu0 %v284_v1 }
  0x2a   :  { %245 = vmatpush3.xpose.msk.msra.mxu0 %vm38_vm0, %v26_v11 }
  0x2b   :  { %246 = vmatprep.subr.mxu0 %v284_v1 }
  0x2e   :  { %247 = vmatpush3.xpose.msk.msra.mxu0 %vm38_vm0, %v25_v12 }
  0x2f   :  { %248 = vmatprep.subr.mxu0 %v284_v1 }
  0x32   :  { %249 = vmatpush3.xpose.msk.msra.mxu0 %vm38_vm0, %v24_v13 }
  0x33   :  { %250 = vmatprep.subr.mxu0 %v284_v1 }
  0x36   :  { %251 = vmatpush3.xpose.msk.msra.mxu0 %vm38_vm0, %v23_v14 }
  0x37   :  { %252 = vmatprep.subr.mxu0 %v284_v1 }
  0x3a   :  { %253 = vmatpush3.xpose.msk.msra.mxu0 %vm38_vm0, %v22_v15 }
  0x3b   :  { %254 = vmatprep.subr.mxu0 %v284_v1 }
  0x3e   :  { %255 = vmatpush3.xpose.msk.msra.mxu0 %vm38_vm0, %v21_v16 }
  0x41   :  { %257 = vmatmul.mubr.msk.f32.vlgmr.msra.gmra.mxu0 %vm38_vm0, %v20_v17 }
 0x101   :  { %v156_v19 = vpop.f32.mrf.mxu0 }
 0x102   :  { %v173_v20 = vadd.f32 %v206_v18, %v156_v19 }
 0x103   :  { %v258_v21 = vpop.f32.mrf.mxu0 }
 0x104   :  { %174 = vst [vmem:[#allocation3] sm:$0xff] %v173_v20 }
 0x105   :  { %273 = shalt.err (!%p270_p4)
}
 0x106   :  { %184 = dma.vmem_to_hbm [thread:$0]  %s182_s22, 128, %s384_s3, [#allocation4]  }
 0x107   :  { %282 = dma.done.wait [#allocation4], 128  }
 0x108   :  { %283 = vsyncadd [#allocation4], 4294967168 }
 0x109   :  { %188 = vsyncpa [#allocation4], 1 }

</bundles_post_ra>
